<compile_context>
chip_gen: v6e
topology: v6e:2x2x1
jax: 0.10.0
libtpu: 0.0.40
codegen_flags: <defaults>
</compile_context>

<pallas_src>
import functools

import jax
import jax.numpy as jnp
from jax.experimental import pallas as pl
from jax.experimental.pallas import tpu as pltpu

_LANES = 128      # f32 lane tile: packed gate / hidden / output tiles are all 128 lanes wide
_SUBLANES = 8     # f32 sublane tile


def _sigmoid(x):
    # Exact: sigmoid(x) == 0.5 * (1 + tanh(x/2)); keeps all nonlinearities on the EUP tanh path.
    return 0.5 * (jnp.tanh(0.5 * x) + 1.0)


def _gru_kernel(x_ref, w_ih_ref, w_hh_ref, b_i_ref, b_h_ref, w_out_ref, b_out_ref,
                out_ref, gi_ref, *, n_steps, batch, hidden):
    """Single-invocation GRU forward with all gates packed into one 128-lane tile.

    Packed gate lane layout (requires 4*hidden <= 128):
        [ n : 0..H | z : H..2H | r : 2H..3H | ... | z(dup) : 128-H..128 ]
    The hidden state h occupies lanes 0..H of a (batch, 128) tile (same lanes as the n gate),
    so the h' blend needs no lane movement; r and z are brought to lanes 0..H with one
    pltpu.roll each.

    x_ref    : (T*Bp, E)   f32   time-major, batch-padded inputs (contiguous (Bp,E) slab per t)
    w_ih_ref : (E, 128)    bf16  packed input->gate weights
    w_hh_ref : (128, 128)  bf16  packed hidden->gate weights (rows H..128 are zero)
    b_i_ref  : (1, 128)    f32   [b_in | b_iz+b_hz | b_ir+b_hr | ... | b_iz+b_hz]
    b_h_ref  : (1, 128)    f32   [b_hn | 0 | ... | 0]        (sits under the r*(...) term)
    w_out_ref: (128, 128)  f32   final linear weights (rows H.., cols O.. zero)
    b_out_ref: (1, 128)    f32
    out_ref  : (Bp, 128)   f32   lane-dense output
    gi_ref   : (T*Bp, 128) f32   scratch for the hoisted input projections
    """
    H = hidden

    # Hoisted input projection for ALL timesteps: one bf16 MXU pass (f32 accumulate) instead
    # of T tiny ones; only h @ W_hh remains on the serial dependency chain.
    gi_ref[...] = (
        jnp.dot(x_ref[...].astype(jnp.bfloat16), w_ih_ref[...],
                preferred_element_type=jnp.float32)
        + b_i_ref[...])

    b_h = b_h_ref[...]                                             # one vreg, cheap to keep live
    lane = jax.lax.broadcasted_iota(jnp.int32, (batch, _LANES), 1)
    h_mask = lane < H                                              # keep padded hidden lanes at 0

    def step(t, h):
        row0 = pl.multiple_of(t * batch, batch)
        gi = gi_ref[pl.ds(row0, batch), :]                         # (Bp, 128) aligned slab
        # W_hh is read from VMEM inside the dot (not hoisted into a long-lived value), so the
        # unrolled body does not pin a large weight register footprint across every iteration.
        gh = jnp.dot(h.astype(jnp.bfloat16), w_hh_ref[...],
                     preferred_element_type=jnp.float32) + b_h
        s = _sigmoid(gi + gh)             # z at lanes H..2H & 128-H..128, r at lanes 2H..3H
        r0 = pltpu.roll(s, 2 * H, axis=1)                          # r -> lanes 0..H
        z0 = pltpu.roll(s, H, axis=1)                              # z -> lanes 0..H (via dup copy)
        n = jnp.tanh(gi + r0 * gh)                                 # n valid in lanes 0..H
        h_new = n + z0 * (h - n)                                   # == (1 - z) * n + z * h
        return jnp.where(h_mask, h_new, 0.0)

    unroll = n_steps if n_steps <= 16 else 8                       # bound code size for long T
    h_final = jax.lax.fori_loop(0, n_steps, step,
                                jnp.zeros((batch, _LANES), jnp.float32), unroll=unroll)

    # Final linear layer: one-time, off the serial chain -> keep exact f32 operands.
    out_ref[...] = (
        jnp.dot(h_final, w_out_ref[...], preferred_element_type=jnp.float32)
        + b_out_ref[...])


def _round_up(x, m):
    return ((x + m - 1) // m) * m


def my_gru_forward(x, params):
    """x: (B, T, E) float32 (batch_first, like the PyTorch module). Returns (B, output_dim)."""
    B, T, E = x.shape
    H = params["w_hh"].shape[1]
    O = params["w_out"].shape[0]
    f32, bf16 = jnp.float32, jnp.bfloat16

    if 4 * H > _LANES or O > _LANES:
        # TODO(synk): for larger H/O fall back to per-gate 128-lane padding (previous layout).
        raise NotImplementedError("gate packing assumes 4*hidden_dim <= 128 and output_dim <= 128")

    Bp = _round_up(max(B, _SUBLANES), _SUBLANES)                   # f32 sublane tile

    # ---- pack weights: gate lane layout [n | z | r | ... | z(dup)] -----------------------
    def pack_gate_cols(w3, in_dim):
        # w3: (3H, in_dim) stacked [r; z; n] like PyTorch; returns (in_dim, 128) transposed/packed.
        w_r, w_z, w_n = jnp.split(w3.astype(f32), 3, axis=0)
        p = jnp.zeros((in_dim, _LANES), f32)
        p = p.at[:, 0:H].set(w_n.T)
        p = p.at[:, H:2 * H].set(w_z.T)
        p = p.at[:, 2 * H:3 * H].set(w_r.T)
        p = p.at[:, _LANES - H:_LANES].set(w_z.T)   # duplicate z -> roll is sign-convention-proof
        return p

    w_ih_p = pack_gate_cols(params["w_ih"], E).astype(bf16)                      # (E, 128)
    w_hh_p = jnp.pad(pack_gate_cols(params["w_hh"], H),
                     ((0, _LANES - H), (0, 0))).astype(bf16)                     # (128, 128)

    b_ir, b_iz, b_in = jnp.split(params["b_ih"].astype(f32), 3)
    b_hr, b_hz, b_hn = jnp.split(params["b_hh"].astype(f32), 3)
    b_i = jnp.zeros((_LANES,), f32)
    b_i = b_i.at[0:H].set(b_in)
    b_i = b_i.at[H:2 * H].set(b_iz + b_hz)
    b_i = b_i.at[2 * H:3 * H].set(b_ir + b_hr)
    b_i = b_i.at[_LANES - H:_LANES].set(b_iz + b_hz)
    b_i = b_i[None, :]                                                           # (1, 128)
    b_h = jnp.zeros((_LANES,), f32).at[0:H].set(b_hn)[None, :]                   # (1, 128)

    w_out_p = jnp.zeros((_LANES, _LANES), f32).at[0:H, 0:O].set(
        params["w_out"].astype(f32).T)                                           # (128, 128)
    b_out_p = jnp.zeros((_LANES,), f32).at[0:O].set(params["b_out"].astype(f32))[None, :]

    # Time-major, batch-padded, flattened to (T*Bp, E): each timestep is a contiguous f32 slab.
    x_tbe = jnp.pad(jnp.transpose(x.astype(f32), (1, 0, 2)),
                    ((0, 0), (0, Bp - B), (0, 0)))                               # (T, Bp, E)
    x2d = x_tbe.reshape(T * Bp, E)

    operands = (x2d, w_ih_p, w_hh_p, b_i, b_h, w_out_p, b_out_p)
    vmem_bytes = sum(int(a.size) * a.dtype.itemsize for a in operands)
    vmem_bytes += T * Bp * _LANES * 4      # gi scratch
    vmem_bytes += Bp * _LANES * 4          # output
    # Explicit scoped-VMEM limit (floor at the smallest default, modest cap for v7x headroom).
    vmem_limit = int(min(max(4 * vmem_bytes, 16 << 20), 48 << 20))
    # TODO(synk): for long T, chunk the hoisted projection (pltpu.emit_pipeline over T-chunks)
    #             instead of keeping x2d / gi fully VMEM-resident.

    out = pl.pallas_call(
        functools.partial(_gru_kernel, n_steps=T, batch=Bp, hidden=H),
        out_shape=jax.ShapeDtypeStruct((Bp, _LANES), f32),
        scratch_shapes=[pltpu.VMEM((T * Bp, _LANES), f32)],
        compiler_params=pltpu.CompilerParams(vmem_limit_bytes=vmem_limit),
    )(*operands)

    return out[:B, :O]


def _reference_forward(x, params):
    """Pure-JAX f32 reference of the same GRU forward (correctness check)."""
    B, T, E = x.shape
    H = params["w_hh"].shape[1]

    def cell(h, x_t):
        gi = x_t @ params["w_ih"].T + params["b_ih"]
        gh = h @ params["w_hh"].T + params["b_hh"]
        i_r, i_z, i_n = gi[:, :H], gi[:, H:2 * H], gi[:, 2 * H:]
        h_r, h_z, h_n = gh[:, :H], gh[:, H:2 * H], gh[:, 2 * H:]
        r = jax.nn.sigmoid(i_r + h_r)
        z = jax.nn.sigmoid(i_z + h_z)
        n = jnp.tanh(i_n + r * h_n)
        h_new = (1.0 - z) * n + z * h
        return h_new, None

    h0 = jnp.zeros((B, H), jnp.float32)
    h_final, _ = jax.lax.scan(cell, h0, jnp.transpose(x, (1, 0, 2)))
    return h_final @ params["w_out"].T + params["b_out"]


def _init_params(key, input_size, hidden_dim, output_dim):
    """Deterministic uniform(-1/sqrt(H), 1/sqrt(H)) init, same shapes as nn.GRU / nn.Linear."""
    k = 1.0 / jnp.sqrt(hidden_dim)
    keys = jax.random.split(key, 6)
    u = lambda kk, shape: jax.random.uniform(kk, shape, jnp.float32, -k, k)
    return {
        "w_ih": u(keys[0], (3 * hidden_dim, input_size)),
        "w_hh": u(keys[1], (3 * hidden_dim, hidden_dim)),
        "b_ih": u(keys[2], (3 * hidden_dim,)),
        "b_hh": u(keys[3], (3 * hidden_dim,)),
        "w_out": u(keys[4], (output_dim, hidden_dim)),
        "b_out": u(keys[5], (output_dim,)),
    }


if __name__ == "__main__":
    # Small shapes implied by the forward: (batch, seq, emb) input, hidden_dim, output_dim.
    B, T, E, H, O = 2, 8, 16, 32, 4

    key = jax.random.PRNGKey(0)
    kx, kp = jax.random.split(key)
    x = jax.random.normal(kx, (B, T, E), jnp.float32)
    params = _init_params(kp, input_size=E, hidden_dim=H, output_dim=O)

    logits = my_gru_forward(x, params)
    logits = jax.block_until_ready(logits)

    ref = _reference_forward(x, params)
    assert logits.shape == (B, O)
    # bf16 MXU operands (f32 accumulation & f32 gate math) -> tolerance loosened vs exact f32.
    err = float(jnp.max(jnp.abs(logits - ref)))
    assert jnp.allclose(logits, ref, atol=3e-2, rtol=3e-2), (
        f"mismatch vs pure-JAX reference (max abs err {err})")

    print("KERNEL_OK")
</pallas_src>

<mosaic_0001>
module attributes {stable_mosaic.version = 11 : i64} {
  func.func @_gru_kernel(%arg0: memref<64x16xf32, #tpu.memory_space<vmem>>, %arg1: memref<16x128xbf16, #tpu.memory_space<vmem>>, %arg2: memref<128x128xbf16, #tpu.memory_space<vmem>>, %arg3: memref<1x128xf32, #tpu.memory_space<vmem>>, %arg4: memref<1x128xf32, #tpu.memory_space<vmem>>, %arg5: memref<128x128xf32, #tpu.memory_space<vmem>>, %arg6: memref<1x128xf32, #tpu.memory_space<vmem>>, %arg7: memref<8x128xf32, #tpu.memory_space<vmem>>, %arg8: memref<64x128xf32, #tpu.memory_space<vmem>>) attributes {dimension_semantics = [], scalar_prefetch = 0 : i64, scratch_operands = 1 : i64, tpu.core_type = #tpu.core_type<tc>} {
    %c0 = arith.constant 0 : index
    %c0_0 = arith.constant 0 : index
    %0 = vector.load %arg0[%c0, %c0_0] : memref<64x16xf32, #tpu.memory_space<vmem>>, vector<64x16xf32>
    %1 = arith.truncf %0 : vector<64x16xf32> to vector<64x16xbf16>
    %c0_1 = arith.constant 0 : index
    %c0_2 = arith.constant 0 : index
    %2 = vector.load %arg1[%c0_1, %c0_2] : memref<16x128xbf16, #tpu.memory_space<vmem>>, vector<16x128xbf16>
    %cst = arith.constant dense<0.000000e+00> : vector<64x128xf32>
    %3 = tpu.matmul %1, %2, %cst {dimension_numbers = #tpu.dot_dimension_numbers<[1], [0], [0], [1], [0, 0, 1, 1], [], []>} : vector<64x16xbf16>, vector<16x128xbf16>, vector<64x128xf32> -> vector<64x128xf32>
    %c0_3 = arith.constant 0 : index
    %c0_4 = arith.constant 0 : index
    %4 = vector.load %arg3[%c0_3, %c0_4] : memref<1x128xf32, #tpu.memory_space<vmem>>, vector<1x128xf32>
    %5 = vector.broadcast %4 : vector<1x128xf32> to vector<64x128xf32>
    %6 = arith.addf %3, %5 : vector<64x128xf32>
    %c0_5 = arith.constant 0 : index
    %c0_6 = arith.constant 0 : index
    %7 = vector.load %arg8[%c0_5, %c0_6] : memref<64x128xf32, #tpu.memory_space<vmem>>, vector<64x128xf32>
    tpu.vector_store %arg8[%c0_5, %c0_6], %6 {strides = array<i32>} : memref<64x128xf32, #tpu.memory_space<vmem>>, vector<64x128xf32>,
    %c0_7 = arith.constant 0 : index
    %c0_8 = arith.constant 0 : index
    %8 = vector.load %arg4[%c0_7, %c0_8] : memref<1x128xf32, #tpu.memory_space<vmem>>, vector<1x128xf32>
    %9 = tpu.iota {dimensions = array<i32: 1>} : vector<8x128xi32>
    %c32_i32 = arith.constant 32 : i32
    %10 = vector.broadcast %c32_i32 : i32 to vector<8x128xi32>
    %11 = arith.cmpi slt, %9, %10 : vector<8x128xi32>
    %cst_9 = arith.constant 0.000000e+00 : f32
    %12 = vector.broadcast %cst_9 : f32 to vector<8x128xf32>
    %c0_i32 = arith.constant 0 : i32
    %c8_i32 = arith.constant 8 : i32
    %13 = arith.muli %c0_i32, %c8_i32 : i32
    %14 = tpu.assume_multiple %13, 8 : i32
    %15 = arith.index_cast %14 : i32 to index
    %c0_10 = arith.constant 0 : index
    %16 = vector.load %arg8[%15, %c0_10] : memref<64x128xf32, #tpu.memory_space<vmem>>, vector<8x128xf32>
    %17 = arith.truncf %12 : vector<8x128xf32> to vector<8x128xbf16>
    %c0_11 = arith.constant 0 : index
    %c0_12 = arith.constant 0 : index
    %18 = vector.load %arg2[%c0_11, %c0_12] : memref<128x128xbf16, #tpu.memory_space<vmem>>, vector<128x128xbf16>
    %cst_13 = arith.constant dense<0.000000e+00> : vector<8x128xf32>
    %19 = tpu.matmul %17, %18, %cst_13 {dimension_numbers = #tpu.dot_dimension_numbers<[1], [0], [0], [1], [0, 0, 1, 1], [], []>} : vector<8x128xbf16>, vector<128x128xbf16>, vector<8x128xf32> -> vector<8x128xf32>
    %20 = vector.broadcast %8 : vector<1x128xf32> to vector<8x128xf32>
    %21 = arith.addf %19, %20 : vector<8x128xf32>
    %22 = arith.addf %16, %21 : vector<8x128xf32>
    %cst_14 = arith.constant 5.000000e-01 : f32
    %23 = vector.broadcast %cst_14 : f32 to vector<8x128xf32>
    %24 = arith.mulf %23, %22 : vector<8x128xf32>
    %25 = math.tanh %24 : vector<8x128xf32>
    %cst_15 = arith.constant 1.000000e+00 : f32
    %26 = vector.broadcast %cst_15 : f32 to vector<8x128xf32>
    %27 = arith.addf %25, %26 : vector<8x128xf32>
    %cst_16 = arith.constant 5.000000e-01 : f32
    %28 = vector.broadcast %cst_16 : f32 to vector<8x128xf32>
    %29 = arith.mulf %28, %27 : vector<8x128xf32>
    %c64_i32 = arith.constant 64 : i32
    %30 = tpu.dynamic_rotate %29 by %c64_i32 dim 1 : vector<8x128xf32>, i32 -> vector<8x128xf32>
    %c32_i32_17 = arith.constant 32 : i32
    %31 = tpu.dynamic_rotate %29 by %c32_i32_17 dim 1 : vector<8x128xf32>, i32 -> vector<8x128xf32>
    %32 = arith.mulf %30, %21 : vector<8x128xf32>
    %33 = arith.addf %16, %32 : vector<8x128xf32>
    %34 = math.tanh %33 : vector<8x128xf32>
    %35 = arith.subf %12, %34 : vector<8x128xf32>
    %36 = arith.mulf %31, %35 : vector<8x128xf32>
    %37 = arith.addf %34, %36 : vector<8x128xf32>
    %cst_18 = arith.constant 0.000000e+00 : f32
    %38 = vector.broadcast %cst_18 : f32 to vector<8x128xf32>
    %39 = arith.select %11, %37, %38 : vector<8x128xi1>, vector<8x128xf32>
    %c1_i32 = arith.constant 1 : i32
    %c8_i32_19 = arith.constant 8 : i32
    %40 = arith.muli %c1_i32, %c8_i32_19 : i32
    %41 = tpu.assume_multiple %40, 8 : i32
    %42 = arith.index_cast %41 : i32 to index
    %c0_20 = arith.constant 0 : index
    %43 = vector.load %arg8[%42, %c0_20] : memref<64x128xf32, #tpu.memory_space<vmem>>, vector<8x128xf32>
    %44 = arith.truncf %39 : vector<8x128xf32> to vector<8x128xbf16>
    %c0_21 = arith.constant 0 : index
    %c0_22 = arith.constant 0 : index
    %45 = vector.load %arg2[%c0_21, %c0_22] : memref<128x128xbf16, #tpu.memory_space<vmem>>, vector<128x128xbf16>
    %cst_23 = arith.constant dense<0.000000e+00> : vector<8x128xf32>
    %46 = tpu.matmul %44, %45, %cst_23 {dimension_numbers = #tpu.dot_dimension_numbers<[1], [0], [0], [1], [0, 0, 1, 1], [], []>} : vector<8x128xbf16>, vector<128x128xbf16>, vector<8x128xf32> -> vector<8x128xf32>
    %47 = vector.broadcast %8 : vector<1x128xf32> to vector<8x128xf32>
    %48 = arith.addf %46, %47 : vector<8x128xf32>
    %49 = arith.addf %43, %48 : vector<8x128xf32>
    %cst_24 = arith.constant 5.000000e-01 : f32
    %50 = vector.broadcast %cst_24 : f32 to vector<8x128xf32>
    %51 = arith.mulf %50, %49 : vector<8x128xf32>
    %52 = math.tanh %51 : vector<8x128xf32>
    %cst_25 = arith.constant 1.000000e+00 : f32
    %53 = vector.broadcast %cst_25 : f32 to vector<8x128xf32>
    %54 = arith.addf %52, %53 : vector<8x128xf32>
    %cst_26 = arith.constant 5.000000e-01 : f32
    %55 = vector.broadcast %cst_26 : f32 to vector<8x128xf32>
    %56 = arith.mulf %55, %54 : vector<8x128xf32>
    %c64_i32_27 = arith.constant 64 : i32
    %57 = tpu.dynamic_rotate %56 by %c64_i32_27 dim 1 : vector<8x128xf32>, i32 -> vector<8x128xf32>
    %c32_i32_28 = arith.constant 32 : i32
    %58 = tpu.dynamic_rotate %56 by %c32_i32_28 dim 1 : vector<8x128xf32>, i32 -> vector<8x128xf32>
    %59 = arith.mulf %57, %48 : vector<8x128xf32>
    %60 = arith.addf %43, %59 : vector<8x128xf32>
    %61 = math.tanh %60 : vector<8x128xf32>
    %62 = arith.subf %39, %61 : vector<8x128xf32>
    %63 = arith.mulf %58, %62 : vector<8x128xf32>
    %64 = arith.addf %61, %63 : vector<8x128xf32>
    %cst_29 = arith.constant 0.000000e+00 : f32
    %65 = vector.broadcast %cst_29 : f32 to vector<8x128xf32>
    %66 = arith.select %11, %64, %65 : vector<8x128xi1>, vector<8x128xf32>
    %c2_i32 = arith.constant 2 : i32
    %c8_i32_30 = arith.constant 8 : i32
    %67 = arith.muli %c2_i32, %c8_i32_30 : i32
    %68 = tpu.assume_multiple %67, 8 : i32
    %69 = arith.index_cast %68 : i32 to index
    %c0_31 = arith.constant 0 : index
    %70 = vector.load %arg8[%69, %c0_31] : memref<64x128xf32, #tpu.memory_space<vmem>>, vector<8x128xf32>
    %71 = arith.truncf %66 : vector<8x128xf32> to vector<8x128xbf16>
    %c0_32 = arith.constant 0 : index
    %c0_33 = arith.constant 0 : index
    %72 = vector.load %arg2[%c0_32, %c0_33] : memref<128x128xbf16, #tpu.memory_space<vmem>>, vector<128x128xbf16>
    %cst_34 = arith.constant dense<0.000000e+00> : vector<8x128xf32>
    %73 = tpu.matmul %71, %72, %cst_34 {dimension_numbers = #tpu.dot_dimension_numbers<[1], [0], [0], [1], [0, 0, 1, 1], [], []>} : vector<8x128xbf16>, vector<128x128xbf16>, vector<8x128xf32> -> vector<8x128xf32>
    %74 = vector.broadcast %8 : vector<1x128xf32> to vector<8x128xf32>
    %75 = arith.addf %73, %74 : vector<8x128xf32>
    %76 = arith.addf %70, %75 : vector<8x128xf32>
    %cst_35 = arith.constant 5.000000e-01 : f32
    %77 = vector.broadcast %cst_35 : f32 to vector<8x128xf32>
    %78 = arith.mulf %77, %76 : vector<8x128xf32>
    %79 = math.tanh %78 : vector<8x128xf32>
    %cst_36 = arith.constant 1.000000e+00 : f32
    %80 = vector.broadcast %cst_36 : f32 to vector<8x128xf32>
    %81 = arith.addf %79, %80 : vector<8x128xf32>
    %cst_37 = arith.constant 5.000000e-01 : f32
    %82 = vector.broadcast %cst_37 : f32 to vector<8x128xf32>
    %83 = arith.mulf %82, %81 : vector<8x128xf32>
    %c64_i32_38 = arith.constant 64 : i32
    %84 = tpu.dynamic_rotate %83 by %c64_i32_38 dim 1 : vector<8x128xf32>, i32 -> vector<8x128xf32>
    %c32_i32_39 = arith.constant 32 : i32
    %85 = tpu.dynamic_rotate %83 by %c32_i32_39 dim 1 : vector<8x128xf32>, i32 -> vector<8x128xf32>
    %86 = arith.mulf %84, %75 : vector<8x128xf32>
    %87 = arith.addf %70, %86 : vector<8x128xf32>
    %88 = math.tanh %87 : vector<8x128xf32>
    %89 = arith.subf %66, %88 : vector<8x128xf32>
    %90 = arith.mulf %85, %89 : vector<8x128xf32>
    %91 = arith.addf %88, %90 : vector<8x128xf32>
    %cst_40 = arith.constant 0.000000e+00 : f32
    %92 = vector.broadcast %cst_40 : f32 to vector<8x128xf32>
    %93 = arith.select %11, %91, %92 : vector<8x128xi1>, vector<8x128xf32>
    %c3_i32 = arith.constant 3 : i32
    %c8_i32_41 = arith.constant 8 : i32
    %94 = arith.muli %c3_i32, %c8_i32_41 : i32
    %95 = tpu.assume_multiple %94, 8 : i32
    %96 = arith.index_cast %95 : i32 to index
    %c0_42 = arith.constant 0 : index
    %97 = vector.load %arg8[%96, %c0_42] : memref<64x128xf32, #tpu.memory_space<vmem>>, vector<8x128xf32>
    %98 = arith.truncf %93 : vector<8x128xf32> to vector<8x128xbf16>
    %c0_43 = arith.constant 0 : index
    %c0_44 = arith.constant 0 : index
    %99 = vector.load %arg2[%c0_43, %c0_44] : memref<128x128xbf16, #tpu.memory_space<vmem>>, vector<128x128xbf16>
    %cst_45 = arith.constant dense<0.000000e+00> : vector<8x128xf32>
    %100 = tpu.matmul %98, %99, %cst_45 {dimension_numbers = #tpu.dot_dimension_numbers<[1], [0], [0], [1], [0, 0, 1, 1], [], []>} : vector<8x128xbf16>, vector<128x128xbf16>, vector<8x128xf32> -> vector<8x128xf32>
    %101 = vector.broadcast %8 : vector<1x128xf32> to vector<8x128xf32>
    %102 = arith.addf %100, %101 : vector<8x128xf32>
    %103 = arith.addf %97, %102 : vector<8x128xf32>
    %cst_46 = arith.constant 5.000000e-01 : f32
    %104 = vector.broadcast %cst_46 : f32 to vector<8x128xf32>
    %105 = arith.mulf %104, %103 : vector<8x128xf32>
    %106 = math.tanh %105 : vector<8x128xf32>
    %cst_47 = arith.constant 1.000000e+00 : f32
    %107 = vector.broadcast %cst_47 : f32 to vector<8x128xf32>
    %108 = arith.addf %106, %107 : vector<8x128xf32>
    %cst_48 = arith.constant 5.000000e-01 : f32
    %109 = vector.broadcast %cst_48 : f32 to vector<8x128xf32>
    %110 = arith.mulf %109, %108 : vector<8x128xf32>
    %c64_i32_49 = arith.constant 64 : i32
    %111 = tpu.dynamic_rotate %110 by %c64_i32_49 dim 1 : vector<8x128xf32>, i32 -> vector<8x128xf32>
    %c32_i32_50 = arith.constant 32 : i32
    %112 = tpu.dynamic_rotate %110 by %c32_i32_50 dim 1 : vector<8x128xf32>, i32 -> vector<8x128xf32>
    %113 = arith.mulf %111, %102 : vector<8x128xf32>
    %114 = arith.addf %97, %113 : vector<8x128xf32>
    %115 = math.tanh %114 : vector<8x128xf32>
    %116 = arith.subf %93, %115 : vector<8x128xf32>
    %117 = arith.mulf %112, %116 : vector<8x128xf32>
    %118 = arith.addf %115, %117 : vector<8x128xf32>
    %cst_51 = arith.constant 0.000000e+00 : f32
    %119 = vector.broadcast %cst_51 : f32 to vector<8x128xf32>
    %120 = arith.select %11, %118, %119 : vector<8x128xi1>, vector<8x128xf32>
    %c4_i32 = arith.constant 4 : i32
    %c8_i32_52 = arith.constant 8 : i32
    %121 = arith.muli %c4_i32, %c8_i32_52 : i32
    %122 = tpu.assume_multiple %121, 8 : i32
    %123 = arith.index_cast %122 : i32 to index
    %c0_53 = arith.constant 0 : index
    %124 = vector.load %arg8[%123, %c0_53] : memref<64x128xf32, #tpu.memory_space<vmem>>, vector<8x128xf32>
    %125 = arith.truncf %120 : vector<8x128xf32> to vector<8x128xbf16>
    %c0_54 = arith.constant 0 : index
    %c0_55 = arith.constant 0 : index
    %126 = vector.load %arg2[%c0_54, %c0_55] : memref<128x128xbf16, #tpu.memory_space<vmem>>, vector<128x128xbf16>
    %cst_56 = arith.constant dense<0.000000e+00> : vector<8x128xf32>
    %127 = tpu.matmul %125, %126, %cst_56 {dimension_numbers = #tpu.dot_dimension_numbers<[1], [0], [0], [1], [0, 0, 1, 1], [], []>} : vector<8x128xbf16>, vector<128x128xbf16>, vector<8x128xf32> -> vector<8x128xf32>
    %128 = vector.broadcast %8 : vector<1x128xf32> to vector<8x128xf32>
    %129 = arith.addf %127, %128 : vector<8x128xf32>
    %130 = arith.addf %124, %129 : vector<8x128xf32>
    %cst_57 = arith.constant 5.000000e-01 : f32
    %131 = vector.broadcast %cst_57 : f32 to vector<8x128xf32>
    %132 = arith.mulf %131, %130 : vector<8x128xf32>
    %133 = math.tanh %132 : vector<8x128xf32>
    %cst_58 = arith.constant 1.000000e+00 : f32
    %134 = vector.broadcast %cst_58 : f32 to vector<8x128xf32>
    %135 = arith.addf %133, %134 : vector<8x128xf32>
    %cst_59 = arith.constant 5.000000e-01 : f32
    %136 = vector.broadcast %cst_59 : f32 to vector<8x128xf32>
    %137 = arith.mulf %136, %135 : vector<8x128xf32>
    %c64_i32_60 = arith.constant 64 : i32
    %138 = tpu.dynamic_rotate %137 by %c64_i32_60 dim 1 : vector<8x128xf32>, i32 -> vector<8x128xf32>
    %c32_i32_61 = arith.constant 32 : i32
    %139 = tpu.dynamic_rotate %137 by %c32_i32_61 dim 1 : vector<8x128xf32>, i32 -> vector<8x128xf32>
    %140 = arith.mulf %138, %129 : vector<8x128xf32>
    %141 = arith.addf %124, %140 : vector<8x128xf32>
    %142 = math.tanh %141 : vector<8x128xf32>
    %143 = arith.subf %120, %142 : vector<8x128xf32>
    %144 = arith.mulf %139, %143 : vector<8x128xf32>
    %145 = arith.addf %142, %144 : vector<8x128xf32>
    %cst_62 = arith.constant 0.000000e+00 : f32
    %146 = vector.broadcast %cst_62 : f32 to vector<8x128xf32>
    %147 = arith.select %11, %145, %146 : vector<8x128xi1>, vector<8x128xf32>
    %c5_i32 = arith.constant 5 : i32
    %c8_i32_63 = arith.constant 8 : i32
    %148 = arith.muli %c5_i32, %c8_i32_63 : i32
    %149 = tpu.assume_multiple %148, 8 : i32
    %150 = arith.index_cast %149 : i32 to index
    %c0_64 = arith.constant 0 : index
    %151 = vector.load %arg8[%150, %c0_64] : memref<64x128xf32, #tpu.memory_space<vmem>>, vector<8x128xf32>
    %152 = arith.truncf %147 : vector<8x128xf32> to vector<8x128xbf16>
    %c0_65 = arith.constant 0 : index
    %c0_66 = arith.constant 0 : index
    %153 = vector.load %arg2[%c0_65, %c0_66] : memref<128x128xbf16, #tpu.memory_space<vmem>>, vector<128x128xbf16>
    %cst_67 = arith.constant dense<0.000000e+00> : vector<8x128xf32>
    %154 = tpu.matmul %152, %153, %cst_67 {dimension_numbers = #tpu.dot_dimension_numbers<[1], [0], [0], [1], [0, 0, 1, 1], [], []>} : vector<8x128xbf16>, vector<128x128xbf16>, vector<8x128xf32> -> vector<8x128xf32>
    %155 = vector.broadcast %8 : vector<1x128xf32> to vector<8x128xf32>
    %156 = arith.addf %154, %155 : vector<8x128xf32>
    %157 = arith.addf %151, %156 : vector<8x128xf32>
    %cst_68 = arith.constant 5.000000e-01 : f32
    %158 = vector.broadcast %cst_68 : f32 to vector<8x128xf32>
    %159 = arith.mulf %158, %157 : vector<8x128xf32>
    %160 = math.tanh %159 : vector<8x128xf32>
    %cst_69 = arith.constant 1.000000e+00 : f32
    %161 = vector.broadcast %cst_69 : f32 to vector<8x128xf32>
    %162 = arith.addf %160, %161 : vector<8x128xf32>
    %cst_70 = arith.constant 5.000000e-01 : f32
    %163 = vector.broadcast %cst_70 : f32 to vector<8x128xf32>
    %164 = arith.mulf %163, %162 : vector<8x128xf32>
    %c64_i32_71 = arith.constant 64 : i32
    %165 = tpu.dynamic_rotate %164 by %c64_i32_71 dim 1 : vector<8x128xf32>, i32 -> vector<8x128xf32>
    %c32_i32_72 = arith.constant 32 : i32
    %166 = tpu.dynamic_rotate %164 by %c32_i32_72 dim 1 : vector<8x128xf32>, i32 -> vector<8x128xf32>
    %167 = arith.mulf %165, %156 : vector<8x128xf32>
    %168 = arith.addf %151, %167 : vector<8x128xf32>
    %169 = math.tanh %168 : vector<8x128xf32>
    %170 = arith.subf %147, %169 : vector<8x128xf32>
    %171 = arith.mulf %166, %170 : vector<8x128xf32>
    %172 = arith.addf %169, %171 : vector<8x128xf32>
    %cst_73 = arith.constant 0.000000e+00 : f32
    %173 = vector.broadcast %cst_73 : f32 to vector<8x128xf32>
    %174 = arith.select %11, %172, %173 : vector<8x128xi1>, vector<8x128xf32>
    %c6_i32 = arith.constant 6 : i32
    %c8_i32_74 = arith.constant 8 : i32
    %175 = arith.muli %c6_i32, %c8_i32_74 : i32
    %176 = tpu.assume_multiple %175, 8 : i32
    %177 = arith.index_cast %176 : i32 to index
    %c0_75 = arith.constant 0 : index
    %178 = vector.load %arg8[%177, %c0_75] : memref<64x128xf32, #tpu.memory_space<vmem>>, vector<8x128xf32>
    %179 = arith.truncf %174 : vector<8x128xf32> to vector<8x128xbf16>
    %c0_76 = arith.constant 0 : index
    %c0_77 = arith.constant 0 : index
    %180 = vector.load %arg2[%c0_76, %c0_77] : memref<128x128xbf16, #tpu.memory_space<vmem>>, vector<128x128xbf16>
    %cst_78 = arith.constant dense<0.000000e+00> : vector<8x128xf32>
    %181 = tpu.matmul %179, %180, %cst_78 {dimension_numbers = #tpu.dot_dimension_numbers<[1], [0], [0], [1], [0, 0, 1, 1], [], []>} : vector<8x128xbf16>, vector<128x128xbf16>, vector<8x128xf32> -> vector<8x128xf32>
    %182 = vector.broadcast %8 : vector<1x128xf32> to vector<8x128xf32>
    %183 = arith.addf %181, %182 : vector<8x128xf32>
    %184 = arith.addf %178, %183 : vector<8x128xf32>
    %cst_79 = arith.constant 5.000000e-01 : f32
    %185 = vector.broadcast %cst_79 : f32 to vector<8x128xf32>
    %186 = arith.mulf %185, %184 : vector<8x128xf32>
    %187 = math.tanh %186 : vector<8x128xf32>
    %cst_80 = arith.constant 1.000000e+00 : f32
    %188 = vector.broadcast %cst_80 : f32 to vector<8x128xf32>
    %189 = arith.addf %187, %188 : vector<8x128xf32>
    %cst_81 = arith.constant 5.000000e-01 : f32
    %190 = vector.broadcast %cst_81 : f32 to vector<8x128xf32>
    %191 = arith.mulf %190, %189 : vector<8x128xf32>
    %c64_i32_82 = arith.constant 64 : i32
    %192 = tpu.dynamic_rotate %191 by %c64_i32_82 dim 1 : vector<8x128xf32>, i32 -> vector<8x128xf32>
    %c32_i32_83 = arith.constant 32 : i32
    %193 = tpu.dynamic_rotate %191 by %c32_i32_83 dim 1 : vector<8x128xf32>, i32 -> vector<8x128xf32>
    %194 = arith.mulf %192, %183 : vector<8x128xf32>
    %195 = arith.addf %178, %194 : vector<8x128xf32>
    %196 = math.tanh %195 : vector<8x128xf32>
    %197 = arith.subf %174, %196 : vector<8x128xf32>
    %198 = arith.mulf %193, %197 : vector<8x128xf32>
    %199 = arith.addf %196, %198 : vector<8x128xf32>
    %cst_84 = arith.constant 0.000000e+00 : f32
    %200 = vector.broadcast %cst_84 : f32 to vector<8x128xf32>
    %201 = arith.select %11, %199, %200 : vector<8x128xi1>, vector<8x128xf32>
    %c7_i32 = arith.constant 7 : i32
    %c8_i32_85 = arith.constant 8 : i32
    %202 = arith.muli %c7_i32, %c8_i32_85 : i32
    %203 = tpu.assume_multiple %202, 8 : i32
    %204 = arith.index_cast %203 : i32 to index
    %c0_86 = arith.constant 0 : index
    %205 = vector.load %arg8[%204, %c0_86] : memref<64x128xf32, #tpu.memory_space<vmem>>, vector<8x128xf32>
    %206 = arith.truncf %201 : vector<8x128xf32> to vector<8x128xbf16>
    %c0_87 = arith.constant 0 : index
    %c0_88 = arith.constant 0 : index
    %207 = vector.load %arg2[%c0_87, %c0_88] : memref<128x128xbf16, #tpu.memory_space<vmem>>, vector<128x128xbf16>
    %cst_89 = arith.constant dense<0.000000e+00> : vector<8x128xf32>
    %208 = tpu.matmul %206, %207, %cst_89 {dimension_numbers = #tpu.dot_dimension_numbers<[1], [0], [0], [1], [0, 0, 1, 1], [], []>} : vector<8x128xbf16>, vector<128x128xbf16>, vector<8x128xf32> -> vector<8x128xf32>
    %209 = vector.broadcast %8 : vector<1x128xf32> to vector<8x128xf32>
    %210 = arith.addf %208, %209 : vector<8x128xf32>
    %211 = arith.addf %205, %210 : vector<8x128xf32>
    %cst_90 = arith.constant 5.000000e-01 : f32
    %212 = vector.broadcast %cst_90 : f32 to vector<8x128xf32>
    %213 = arith.mulf %212, %211 : vector<8x128xf32>
    %214 = math.tanh %213 : vector<8x128xf32>
    %cst_91 = arith.constant 1.000000e+00 : f32
    %215 = vector.broadcast %cst_91 : f32 to vector<8x128xf32>
    %216 = arith.addf %214, %215 : vector<8x128xf32>
    %cst_92 = arith.constant 5.000000e-01 : f32
    %217 = vector.broadcast %cst_92 : f32 to vector<8x128xf32>
    %218 = arith.mulf %217, %216 : vector<8x128xf32>
    %c64_i32_93 = arith.constant 64 : i32
    %219 = tpu.dynamic_rotate %218 by %c64_i32_93 dim 1 : vector<8x128xf32>, i32 -> vector<8x128xf32>
    %c32_i32_94 = arith.constant 32 : i32
    %220 = tpu.dynamic_rotate %218 by %c32_i32_94 dim 1 : vector<8x128xf32>, i32 -> vector<8x128xf32>
    %221 = arith.mulf %219, %210 : vector<8x128xf32>
    %222 = arith.addf %205, %221 : vector<8x128xf32>
    %223 = math.tanh %222 : vector<8x128xf32>
    %224 = arith.subf %201, %223 : vector<8x128xf32>
    %225 = arith.mulf %220, %224 : vector<8x128xf32>
    %226 = arith.addf %223, %225 : vector<8x128xf32>
    %cst_95 = arith.constant 0.000000e+00 : f32
    %227 = vector.broadcast %cst_95 : f32 to vector<8x128xf32>
    %228 = arith.select %11, %226, %227 : vector<8x128xi1>, vector<8x128xf32>
    %c8_i32_96 = arith.constant 8 : i32
    %c0_97 = arith.constant 0 : index
    %c0_98 = arith.constant 0 : index
    %229 = vector.load %arg5[%c0_97, %c0_98] : memref<128x128xf32, #tpu.memory_space<vmem>>, vector<128x128xf32>
    %cst_99 = arith.constant dense<0.000000e+00> : vector<8x128xf32>
    %230 = tpu.matmul %228, %229, %cst_99 {dimension_numbers = #tpu.dot_dimension_numbers<[1], [0], [0], [1], [0, 0, 1, 1], [], []>} : vector<8x128xf32>, vector<128x128xf32>, vector<8x128xf32> -> vector<8x128xf32>
    %c0_100 = arith.constant 0 : index
    %c0_101 = arith.constant 0 : index
    %231 = vector.load %arg6[%c0_100, %c0_101] : memref<1x128xf32, #tpu.memory_space<vmem>>, vector<1x128xf32>
    %232 = vector.broadcast %231 : vector<1x128xf32> to vector<8x128xf32>
    %233 = arith.addf %230, %232 : vector<8x128xf32>
    %c0_102 = arith.constant 0 : index
    %c0_103 = arith.constant 0 : index
    %234 = vector.load %arg7[%c0_102, %c0_103] : memref<8x128xf32, #tpu.memory_space<vmem>>, vector<8x128xf32>
    tpu.vector_store %arg7[%c0_102, %c0_103], %233 {strides = array<i32>} : memref<8x128xf32, #tpu.memory_space<vmem>>, vector<8x128xf32>,
    return
  }
}

</mosaic_0001>

<bundles_post_ra>
// kernel: tpu_custom_call.1
= control target key start
LH: loop header
LB: loop body
LE: loop exit
PB: predicated region body
PF: predicated region fallthrough
CT: control target
= control target key end

     0   :  { %12 = vsyncpa [#allocation4], 0  ;;  %s1635_s0 = inlined_call_operand.vmem [shape: f32[64,16], index: 0, kind: input, shape index: {}]   ;;  %s1636_s1 = inlined_call_operand.vmem [shape: bf16[16,128], index: 1, kind: input, shape index: {}]   ;;  %s1637_s2 = inlined_call_operand.vmem [shape: bf16[128,128], index: 2, kind: input, shape index: {}]   ;;  %s1638_s3 = inlined_call_operand.vmem [shape: f32[1,128], index: 3, kind: input, shape index: {}]   ;;  %s1639_s4 = inlined_call_operand.vmem [shape: f32[1,128], index: 4, kind: input, shape index: {}]   ;;  %s1640_s5 = inlined_call_operand.hbm [shape: f32[128,128], index: 5, kind: input, shape index: {}]   ;;  %s1641_s6 = inlined_call_operand.vmem [shape: f32[1,128], index: 6, kind: input, shape index: {}]   ;;  %s1642_s7 = inlined_call_operand.hbm [shape: f32[8,128], index: 7, kind: output, shape index: {}]  }
   0x1   :  { %13 = vsyncpa [#allocation5], 0  ;;  %s1239_s24 = smov [#allocation3]  }
   0x2   :  { %s29_s25 = sshll.u32 %s1239_s24, 4  ;;  %s30_s25 = int_to_ptr.vmem [resolvable:$true] %s29_s25 }
   0x3   :  { %s1203_s26 = scalar_lea.vmem %s30_s25, 2048  ;;  %p1208_p1 = scmp.lt.s32.totalorder %s30_s25, %s30_s25 }
   0x4   :  { %p1204_p0 = scmp.ne.s32.totalorder %s30_s25, %s1203_s26  ;;  %p1209_p2 = scmp.lt.s32.totalorder %s1203_s26, %s1203_s26 }
   0x6   :  { %p1210_p3 = por %p1209_p2, %p1208_p1 }
   0x8   :  { %p1211_p4 = pnand %p1210_p3, %p1204_p0 }
   0xa   :  { %1214 = shalt.err (!%p1211_p4)
}
   0xb   :  { %s1240_s27 = smov 128   ;;  %s1241_s28 = smov 8  }
   0xc   :  { %35 = dma.hbm_to_vmem [thread:$0]  %s1640_s5, 2048, %s30_s25, [#allocation4], %s1240_s27, %s1240_s27, %s1241_s28  }
   0xd   :  { %1235 = dma.done.wait [#allocation4], 2048  }
   0xe   :  { %1236 = vsyncadd [#allocation4], 4294965248  ;;  %v1242_v0 = vmov 0.0   ;;  %vm1243_vm0 = vmmov 0   ;;  %v1297_v1 = vld [vmem:[%s1637_s2 + $0x38] sm:$0xff]   ;;  %v1303_v2 = vld [vmem:[%s1637_s2 + $0x30] sm:$0xff]   ;;  %v156_v41 = vlaneseq }
   0xf   :  { %950 = vmatprep.subr.bf16.mxu1 %v1242_v0  ;;  %966 = vmatprep.mubr.msk.bf16.mxu1 %vm1243_vm0, %v1242_v0  ;;  %v1159_v3 = vld [vmem:[%s1636_s1] sm:$0xff]   ;;  %v1313_v4 = vld [vmem:[%s1637_s2 + $0x28] sm:$0xff]   ;;  %vm69_vm1 = vcmask 130048   ;;  %v44_v7 = vld [vmem:[%s1635_s0 + $0x10] sm:$0xff]  ;;  %v1244_v16 = vmov 0   ;;  %s1245_s17 = smov 64  }
  0x10   :  { %951 = vmatpush3.bf16.msra.mxu1 %v1297_v1  ;;  %940 = vmatprep.subr.bf16.mxu0 %v1159_v3  ;;  %v42_v5 = vld [vmem:[%s1635_s0] sm:$0xff]  ;;  %v43_v6 = vld [vmem:[%s1635_s0 + $0x8] sm:$0xff]  ;;  %v45_v9 = vld [vmem:[%s1635_s0 + $0x18] sm:$0xff]  ;;  %s1246_s18 = smov 32   ;;  %v1434_v42 = vand.u32 127, %v156_v41  ;;  %s1247_s19 = smov [#allocation6]  }
  0x11   :  { %952 = vmatprep.subr.bf16.mxu1 %v1242_v0  ;;  %941 = vmatpush3.bf16.msra.mxu0 %v1159_v3  ;;  %v50_v8 = vpack.c.bf16 %v43_v6, %v42_v5  ;;  %v51_v10 = vpack.c.bf16 %v45_v9, %v44_v7  ;;  %v1333_v11 = vld [vmem:[%s1637_s2 + $0x20] sm:$0xff]   ;;  %v1344_v12 = vld [vmem:[%s1637_s2 + $0x18] sm:$0xff]   ;;  %v1353_v13 = vld [vmem:[%s1637_s2 + $0x10] sm:$0xff]   ;;  %s799_s20 = sshll.u32 %s1247_s19, 4  ;;  %s800_s20 = int_to_ptr.vmem [resolvable:$true] %s799_s20 }
  0x12   :  { %970 = vmatprep.subr.bf16.mxu0 %v1242_v0  ;;  %v1362_v14 = vld [vmem:[%s1637_s2 + $0x8] sm:$0xff]   ;;  %v1371_v15 = vld [vmem:[%s1637_s2] sm:$0xff]   ;;  %v48_v34 = vld [vmem:[%s1635_s0 + $0x30] sm:$0xff]  ;;  %vm158_vm2 = vcmp.lt.s32.totalorder %v1434_v42, 32  ;;  %s1215_s21 = scalar_lea.vmem %s800_s20, 128  ;;  %p1220_p6 = scmp.lt.s32.totalorder %s800_s20, %s800_s20 }
  0x13   :  { %942 = vmatprep.mubr.msk.bf16.mxu0 %vm69_vm1, %v50_v8  ;;  %v1407_v18 = vld [vmem:[%s1638_s3] ss:$0 sm:$0xff]  ;;  %v47_v31 = vld [vmem:[%s1635_s0 + $0x28] sm:$0xff]  ;;  %v49_v35 = vld [vmem:[%s1635_s0 + $0x38] sm:$0xff]  ;;  %p1216_p5 = scmp.ne.s32.totalorder %s800_s20, %s1215_s21  ;;  %p1221_p7 = scmp.lt.s32.totalorder %s1215_s21, %s1215_s21 }
  0x14   :  { %953 = vmatpush3.bf16.msra.mxu1 %v1303_v2  ;;  %943 = vmatmul.mubr.msk.bf16.vlgmr.msra.gmra.mxu0 %vm69_vm1, %v51_v10  ;;  %v1412_v19 = vld [vmem:[%s1639_s4] ss:$0 sm:$0xff]  ;;  %v53_v36 = vpack.c.bf16 %v49_v35, %v48_v34  ;;  %vm1440_vm3 = vmpackc.low %vm158_vm2, %vm158_vm2 }
  0x15   :  { %954 = vmatprep.subr.bf16.mxu1 %v1242_v0  ;;  %971 = vmatpush3.bf16.msra.mxu0 %v1297_v1  ;;  %v46_v30 = vld [vmem:[%s1635_s0 + $0x20] sm:$0xff]  ;;  %p1222_p8 = por %p1221_p7, %p1220_p6 }
  0x16   :  { %972 = vmatprep.subr.bf16.mxu0 %v1242_v0  ;;  %v52_v33 = vpack.c.bf16 %v47_v31, %v46_v30 }
  0x17   :  { %p1223_p9 = pnand %p1222_p8, %p1216_p5 }
  0x18   :  { %955 = vmatpush3.bf16.msra.mxu1 %v1313_v4  ;;  %946 = vmatprep.mubr.msk.bf16.mxu0 %vm69_vm1, %v52_v33 }
  0x19   :  { %956 = vmatprep.subr.bf16.mxu1 %v1242_v0  ;;  %973 = vmatpush3.bf16.msra.mxu0 %v1303_v2 }
  0x1a   :  { %974 = vmatprep.subr.bf16.mxu0 %v1242_v0 }
  0x1c   :  { %957 = vmatpush3.bf16.msra.mxu1 %v1333_v11  ;;  %947 = vmatmul.mubr.msk.bf16.gmra.mxu0 %vm69_vm1, %v53_v36 }
  0x1d   :  { %958 = vmatprep.subr.bf16.mxu1 %v1242_v0  ;;  %975 = vmatpush3.bf16.msra.mxu0 %v1313_v4 }
  0x1e   :  { %976 = vmatprep.subr.bf16.mxu0 %v1242_v0  ;;  %986 = vmatprep.mubr.msk.bf16.mxu0 %vm1243_vm0, %v1242_v0 }
  0x20   :  { %959 = vmatpush3.bf16.msra.mxu1 %v1344_v12 }
  0x21   :  { %960 = vmatprep.subr.bf16.mxu1 %v1242_v0  ;;  %977 = vmatpush3.bf16.msra.mxu0 %v1333_v11 }
  0x22   :  { %978 = vmatprep.subr.bf16.mxu0 %v1242_v0 }
  0x24   :  { %961 = vmatpush3.bf16.msra.mxu1 %v1353_v13 }
  0x25   :  { %962 = vmatprep.subr.bf16.mxu1 %v1242_v0  ;;  %979 = vmatpush3.bf16.msra.mxu0 %v1344_v12 }
  0x26   :  { %980 = vmatprep.subr.bf16.mxu0 %v1242_v0 }
  0x28   :  { %963 = vmatpush3.bf16.msra.mxu1 %v1362_v14 }
  0x29   :  { %964 = vmatprep.subr.bf16.mxu1 %v1242_v0  ;;  %981 = vmatpush3.bf16.msra.mxu0 %v1353_v13 }
  0x2a   :  { %982 = vmatprep.subr.bf16.mxu0 %v1242_v0 }
  0x2c   :  { %965 = vmatpush3.bf16.msra.mxu1 %v1371_v15 }
  0x2d   :  { %990 = vmatprep.subr.bf16.mxu1 %v1242_v0  ;;  %983 = vmatpush3.bf16.msra.mxu0 %v1362_v14 }
  0x2e   :  { %984 = vmatprep.subr.bf16.mxu0 %v1242_v0 }
  0x2f   :  { %967 = vmatmul.mubr.bf16.vlgmr.msra.gmra.mxu1 %v1244_v16 }
  0x30   :  { %991 = vmatpush3.bf16.msra.mxu1 %v1297_v1  ;;  %1006 = vmatprep.mubr.msk.bf16.mxu1 %vm1243_vm0, %v1242_v0 }
  0x31   :  { %992 = vmatprep.subr.bf16.mxu1 %v1242_v0  ;;  %985 = vmatpush3.bf16.msra.mxu0 %v1371_v15 }
  0x32   :  { %1010 = vmatprep.subr.bf16.mxu0 %v1242_v0 }
  0x34   :  { %993 = vmatpush3.bf16.msra.mxu1 %v1303_v2 }
  0x35   :  { %994 = vmatprep.subr.bf16.mxu1 %v1242_v0 }
  0x38   :  { %995 = vmatpush3.bf16.msra.mxu1 %v1313_v4 }
  0x39   :  { %996 = vmatprep.subr.bf16.mxu1 %v1242_v0 }
  0x3c   :  { %997 = vmatpush3.bf16.msra.mxu1 %v1333_v11 }
  0x3d   :  { %998 = vmatprep.subr.bf16.mxu1 %v1242_v0 }
  0x40   :  { %999 = vmatpush3.bf16.msra.mxu1 %v1344_v12 }
  0x41   :  { %1000 = vmatprep.subr.bf16.mxu1 %v1242_v0 }
  0x44   :  { %1001 = vmatpush3.bf16.msra.mxu1 %v1353_v13 }
  0x45   :  { %1002 = vmatprep.subr.bf16.mxu1 %v1242_v0 }
  0x48   :  { %1003 = vmatpush3.bf16.msra.mxu1 %v1362_v14 }
  0x49   :  { %1004 = vmatprep.subr.bf16.mxu1 %v1242_v0 }
  0x4c   :  { %1005 = vmatpush3.bf16.msra.mxu1 %v1371_v15 }
  0x4d   :  { %1030 = vmatprep.subr.bf16.mxu1 %v1242_v0 }
  0xd4   :  { %v1402_v17 = vpop.f32.mrf.mxu0 }
  0xd6   :  { %v116_v20 = vpop.f32.mrf.mxu0 }
  0xd7   :  { %v117_v22 = vadd.f32 %v1407_v18, %v116_v20 }
  0xd8   :  { %v1464_v50 = vpop.f32.mrf.mxu0 }
  0xda   :  { %v119_v51 = vpop.f32.mrf.mxu0 }
  0xdb   :  { %v120_v57 = vadd.f32 %v1407_v18, %v119_v51 }
  0xdc   :  { %v1466_v52 = vpop.f32.mrf.mxu0 }
  0xde   :  { %v1468_v53 = vpop.f32.mrf.mxu0 }
  0xe0   :  { %v1470_v54 = vpop.f32.mrf.mxu0 }
  0xe1   :  { %v144_v48 = vadd.f32 %v1470_v54, %v1407_v18  ;;  %v705_v54 = vld [vmem:[#allocation3 + $0x30] sm:$0xff] }
  0xe2   :  { %v1472_v55 = vpop.f32.mrf.mxu0 }
  0xef   :  { %v264_v21 = vpop.f32.mrf.mxu1 }
  0xf0   :  { %v265_v23 = vadd.f32 %v1412_v19, %v264_v21 }
  0xf1   :  { %v968_v24 = vpop.f32.mrf.mxu1 }
  0xf2   :  { %v270_v25 = vadd.f32 %v265_v23, %v117_v22 }
  0xf3   :  { %v267_v26 = vpop.f32.mrf.mxu1 }
  0xf4   :  { %v271_v27 = vmul.f32 0.5, %v270_v25  ;;  %v125_v26 = vadd.f32 %v1402_v17, %v1407_v18 }
  0xf5   :  { %v969_v28 = vpop.f32.mrf.mxu1 }
  0xf6   :  { %1163 = vtanh.f32 %v271_v27 }
 0x103   :  { %v1164_v29 = vpop.eup %1163 }
 0x104   :  { %v273_v32 = vadd.f32 1.0, %v1164_v29 }
 0x106   :  { %v274_v37 = vmul.f32 0.5, %v273_v32 }
 0x108   :  { %275 = vrot.lane.b32.xlu0 %v274_v37, %s1245_s17 }
 0x10c   :  { %277 = vrot.lane.b32.xlu0 %v274_v37, %s1246_s18 }
 0x17a   :  { %v276_v38 = vpop.permute.xlu0 %275 }
 0x17b   :  { %v279_v39 = vmul.f32 %v276_v38, %v265_v23 }
 0x17d   :  { %v280_v40 = vadd.f32 %v279_v39, %v117_v22 }
 0x17e   :  { %v278_v45 = vpop.permute.xlu0 %277 }
 0x17f   :  { %1165 = vtanh.f32 %v280_v40 }
 0x18c   :  { %v1166_v43 = vpop.eup %1165 }
 0x18d   :  { %v282_v44 = vsub.f32 0.0, %v1166_v43 }
 0x18f   :  { %v283_v46 = vmul.f32 %v282_v44, %v278_v45 }
 0x191   :  { %v284_v47 = vadd.f32 %v1166_v43, %v283_v46 }
 0x193   :  { %v824_v49 = vpack.c.bf16 %v284_v47, %v284_v47  ;;  %v285_v16 = vsel %vm158_vm2, %v284_v47, 0.0  ;;  %v128_v47 = vadd.f32 %v1464_v50, %v1407_v18 }
 0x195   :  { %987 = vmatmul.mubr.msk.bf16.vlgmr.msra.gmra.mxu0 %vm1440_vm3, %v824_v49 }
 0x196   :  { %1011 = vmatpush3.bf16.msra.mxu0 %v1297_v1  ;;  %1026 = vmatprep.mubr.msk.bf16.mxu0 %vm1243_vm0, %v1242_v0 }
 0x197   :  { %1012 = vmatprep.subr.bf16.mxu0 %v1242_v0 }
 0x19a   :  { %1013 = vmatpush3.bf16.msra.mxu0 %v1303_v2 }
 0x19b   :  { %1014 = vmatprep.subr.bf16.mxu0 %v1242_v0 }
 0x19e   :  { %1015 = vmatpush3.bf16.msra.mxu0 %v1313_v4 }
 0x19f   :  { %1016 = vmatprep.subr.bf16.mxu0 %v1242_v0 }
 0x1a2   :  { %1017 = vmatpush3.bf16.msra.mxu0 %v1333_v11 }
 0x1a3   :  { %1018 = vmatprep.subr.bf16.mxu0 %v1242_v0 }
 0x1a6   :  { %1019 = vmatpush3.bf16.msra.mxu0 %v1344_v12 }
 0x1a7   :  { %1020 = vmatprep.subr.bf16.mxu0 %v1242_v0 }
 0x1aa   :  { %1021 = vmatpush3.bf16.msra.mxu0 %v1353_v13 }
 0x1ab   :  { %1022 = vmatprep.subr.bf16.mxu0 %v1242_v0 }
 0x1ae   :  { %1023 = vmatpush3.bf16.msra.mxu0 %v1362_v14 }
 0x1af   :  { %1024 = vmatprep.subr.bf16.mxu0 %v1242_v0 }
 0x1b2   :  { %1025 = vmatpush3.bf16.msra.mxu0 %v1371_v15 }
 0x1b3   :  { %1050 = vmatprep.subr.bf16.mxu0 %v1242_v0 }
 0x255   :  { %v323_v56 = vpop.f32.mrf.mxu0 }
 0x256   :  { %v324_v58 = vadd.f32 %v1412_v19, %v323_v56 }
 0x257   :  { %v988_v59 = vpop.f32.mrf.mxu0 }
 0x258   :  { %v329_v60 = vadd.f32 %v324_v58, %v120_v57 }
 0x259   :  { %v326_v61 = vpop.f32.mrf.mxu0 }
 0x25a   :  { %v330_v62 = vmul.f32 0.5, %v329_v60 }
 0x25b   :  { %v989_v63 = vpop.f32.mrf.mxu0 }
 0x25c   :  { %1167 = vtanh.f32 %v330_v62 }
 0x269   :  { %v1168_v3 = vpop.eup %1167 }
 0x26a   :  { %v332_v5 = vadd.f32 1.0, %v1168_v3 }
 0x26c   :  { %v333_v6 = vmul.f32 0.5, %v332_v5 }
 0x26e   :  { %334 = vrot.lane.b32.xlu1 %v333_v6, %s1245_s17 }
 0x272   :  { %336 = vrot.lane.b32.xlu1 %v333_v6, %s1246_s18 }
 0x2e0   :  { %v335_v7 = vpop.permute.xlu1 %334 }
 0x2e1   :  { %v338_v8 = vmul.f32 %v335_v7, %v324_v58 }
 0x2e3   :  { %v339_v9 = vadd.f32 %v338_v8, %v120_v57 }
 0x2e4   :  { %v337_v21 = vpop.permute.xlu1 %336 }
 0x2e5   :  { %1169 = vtanh.f32 %v339_v9 }
 0x2f2   :  { %v1170_v10 = vpop.eup %1169 }
 0x2f3   :  { %v341_v20 = vsub.f32 %v285_v16, %v1170_v10 }
 0x2f5   :  { %v342_v22 = vmul.f32 %v341_v20, %v337_v21  ;;  %v133_v21 = vadd.f32 %v1407_v18, %v1468_v53 }
 0x2f7   :  { %v343_v23 = vadd.f32 %v1170_v10, %v342_v22 }
 0x2f9   :  { %v827_v24 = vpack.c.bf16 %v343_v23, %v343_v23  ;;  %v344_v39 = vsel %vm158_vm2, %v343_v23, 0.0 }
 0x2fb   :  { %1007 = vmatmul.mubr.msk.bf16.vlgmr.msra.gmra.mxu1 %vm1440_vm3, %v827_v24 }
 0x2fc   :  { %1031 = vmatpush3.bf16.msra.mxu1 %v1297_v1  ;;  %1046 = vmatprep.mubr.msk.bf16.mxu1 %vm1243_vm0, %v1242_v0 }
 0x2fd   :  { %1032 = vmatprep.subr.bf16.mxu1 %v1242_v0 }
 0x300   :  { %1033 = vmatpush3.bf16.msra.mxu1 %v1303_v2 }
 0x301   :  { %1034 = vmatprep.subr.bf16.mxu1 %v1242_v0 }
 0x304   :  { %1035 = vmatpush3.bf16.msra.mxu1 %v1313_v4 }
 0x305   :  { %1036 = vmatprep.subr.bf16.mxu1 %v1242_v0 }
 0x308   :  { %1037 = vmatpush3.bf16.msra.mxu1 %v1333_v11 }
 0x309   :  { %1038 = vmatprep.subr.bf16.mxu1 %v1242_v0 }
 0x30c   :  { %1039 = vmatpush3.bf16.msra.mxu1 %v1344_v12 }
 0x30d   :  { %1040 = vmatprep.subr.bf16.mxu1 %v1242_v0 }
 0x310   :  { %1041 = vmatpush3.bf16.msra.mxu1 %v1353_v13 }
 0x311   :  { %1042 = vmatprep.subr.bf16.mxu1 %v1242_v0 }
 0x314   :  { %1043 = vmatpush3.bf16.msra.mxu1 %v1362_v14 }
 0x315   :  { %1044 = vmatprep.subr.bf16.mxu1 %v1242_v0 }
 0x318   :  { %1045 = vmatpush3.bf16.msra.mxu1 %v1371_v15 }
 0x319   :  { %1070 = vmatprep.subr.bf16.mxu1 %v1242_v0 }
 0x3bb   :  { %v382_v25 = vpop.f32.mrf.mxu1 }
 0x3bc   :  { %v383_v27 = vadd.f32 %v1412_v19, %v382_v25 }
 0x3bd   :  { %v1008_v28 = vpop.f32.mrf.mxu1 }
 0x3be   :  { %v388_v29 = vadd.f32 %v383_v27, %v125_v26 }
 0x3bf   :  { %v385_v30 = vpop.f32.mrf.mxu1 }
 0x3c0   :  { %v389_v31 = vmul.f32 0.5, %v388_v29 }
 0x3c1   :  { %v1009_v32 = vpop.f32.mrf.mxu1 }
 0x3c2   :  { %1171 = vtanh.f32 %v389_v31 }
 0x3cf   :  { %v1172_v33 = vpop.eup %1171 }
 0x3d0   :  { %v391_v34 = vadd.f32 1.0, %v1172_v33 }
 0x3d2   :  { %v392_v35 = vmul.f32 0.5, %v391_v34 }
 0x3d4   :  { %395 = vrot.lane.b32.xlu1 %v392_v35, %s1246_s18  ;;  %393 = vrot.lane.b32.xlu0 %v392_v35, %s1245_s17 }
 0x446   :  { %v394_v36 = vpop.permute.xlu0 %393  ;;  %v396_v41 = vpop.permute.xlu1 %395 }
 0x447   :  { %v397_v37 = vmul.f32 %v394_v36, %v383_v27 }
 0x449   :  { %v398_v38 = vadd.f32 %v397_v37, %v125_v26 }
 0x44b   :  { %1173 = vtanh.f32 %v398_v38 }
 0x458   :  { %v1174_v17 = vpop.eup %1173 }
 0x459   :  { %v400_v40 = vsub.f32 %v344_v39, %v1174_v17 }
 0x45b   :  { %v401_v43 = vmul.f32 %v400_v40, %v396_v41 }
 0x45d   :  { %v402_v44 = vadd.f32 %v1174_v17, %v401_v43 }
 0x45f   :  { %v830_v45 = vpack.c.bf16 %v402_v44, %v402_v44  ;;  %v403_v6 = vsel %vm158_vm2, %v402_v44, 0.0 }
 0x461   :  { %1027 = vmatmul.mubr.msk.bf16.vlgmr.msra.gmra.mxu0 %vm1440_vm3, %v830_v45 }
 0x462   :  { %1051 = vmatpush3.bf16.msra.mxu0 %v1297_v1  ;;  %1066 = vmatprep.mubr.msk.bf16.mxu0 %vm1243_vm0, %v1242_v0 }
 0x463   :  { %1052 = vmatprep.subr.bf16.mxu0 %v1242_v0 }
 0x466   :  { %1053 = vmatpush3.bf16.msra.mxu0 %v1303_v2 }
 0x467   :  { %1054 = vmatprep.subr.bf16.mxu0 %v1242_v0 }
 0x46a   :  { %1055 = vmatpush3.bf16.msra.mxu0 %v1313_v4 }
 0x46b   :  { %1056 = vmatprep.subr.bf16.mxu0 %v1242_v0 }
 0x46e   :  { %1057 = vmatpush3.bf16.msra.mxu0 %v1333_v11 }
 0x46f   :  { %1058 = vmatprep.subr.bf16.mxu0 %v1242_v0 }
 0x472   :  { %1059 = vmatpush3.bf16.msra.mxu0 %v1344_v12 }
 0x473   :  { %1060 = vmatprep.subr.bf16.mxu0 %v1242_v0 }
 0x476   :  { %1061 = vmatpush3.bf16.msra.mxu0 %v1353_v13 }
 0x477   :  { %1062 = vmatprep.subr.bf16.mxu0 %v1242_v0 }
 0x47a   :  { %1063 = vmatpush3.bf16.msra.mxu0 %v1362_v14 }
 0x47b   :  { %1064 = vmatprep.subr.bf16.mxu0 %v1242_v0 }
 0x47e   :  { %1065 = vmatpush3.bf16.msra.mxu0 %v1371_v15 }
 0x47f   :  { %1090 = vmatprep.subr.bf16.mxu0 %v1242_v0 }
 0x521   :  { %v441_v46 = vpop.f32.mrf.mxu0 }
 0x522   :  { %v442_v49 = vadd.f32 %v1412_v19, %v441_v46 }
 0x523   :  { %v1028_v51 = vpop.f32.mrf.mxu0 }
 0x524   :  { %v447_v56 = vadd.f32 %v442_v49, %v128_v47 }
 0x525   :  { %v444_v57 = vpop.f32.mrf.mxu0 }
 0x526   :  { %v448_v58 = vmul.f32 0.5, %v447_v56 }
 0x527   :  { %v1029_v59 = vpop.f32.mrf.mxu0 }
 0x528   :  { %1175 = vtanh.f32 %v448_v58  ;;  %v141_v59 = vadd.f32 %v1466_v52, %v1407_v18 }
 0x535   :  { %v1176_v60 = vpop.eup %1175 }
 0x536   :  { %v450_v61 = vadd.f32 1.0, %v1176_v60 }
 0x538   :  { %v451_v62 = vmul.f32 0.5, %v450_v61 }
 0x53a   :  { %454 = vrot.lane.b32.xlu1 %v451_v62, %s1246_s18  ;;  %452 = vrot.lane.b32.xlu0 %v451_v62, %s1245_s17 }
 0x5ac   :  { %v453_v63 = vpop.permute.xlu0 %452  ;;  %v455_v8 = vpop.permute.xlu1 %454 }
 0x5ad   :  { %v456_v3 = vmul.f32 %v453_v63, %v442_v49 }
 0x5af   :  { %v457_v5 = vadd.f32 %v456_v3, %v128_v47 }
 0x5b1   :  { %1177 = vtanh.f32 %v457_v5 }
 0x5be   :  { %v1178_v50 = vpop.eup %1177 }
 0x5bf   :  { %v459_v7 = vsub.f32 %v403_v6, %v1178_v50 }
 0x5c1   :  { %v460_v9 = vmul.f32 %v459_v7, %v455_v8 }
 0x5c3   :  { %v461_v10 = vadd.f32 %v1178_v50, %v460_v9 }
 0x5c5   :  { %v833_v16 = vpack.c.bf16 %v461_v10, %v461_v10  ;;  %v462_v34 = vsel %vm158_vm2, %v461_v10, 0.0 }
 0x5c7   :  { %1047 = vmatmul.mubr.msk.bf16.vlgmr.msra.gmra.mxu1 %vm1440_vm3, %v833_v16 }
 0x5c8   :  { %1071 = vmatpush3.bf16.msra.mxu1 %v1297_v1  ;;  %1086 = vmatprep.mubr.msk.bf16.mxu1 %vm1243_vm0, %v1242_v0 }
 0x5c9   :  { %1072 = vmatprep.subr.bf16.mxu1 %v1242_v0 }
 0x5cc   :  { %1073 = vmatpush3.bf16.msra.mxu1 %v1303_v2 }
 0x5cd   :  { %1074 = vmatprep.subr.bf16.mxu1 %v1242_v0 }
 0x5d0   :  { %1075 = vmatpush3.bf16.msra.mxu1 %v1313_v4 }
 0x5d1   :  { %1076 = vmatprep.subr.bf16.mxu1 %v1242_v0 }
 0x5d4   :  { %1077 = vmatpush3.bf16.msra.mxu1 %v1333_v11 }
 0x5d5   :  { %1078 = vmatprep.subr.bf16.mxu1 %v1242_v0 }
 0x5d8   :  { %1079 = vmatpush3.bf16.msra.mxu1 %v1344_v12 }
 0x5d9   :  { %1080 = vmatprep.subr.bf16.mxu1 %v1242_v0 }
 0x5dc   :  { %1081 = vmatpush3.bf16.msra.mxu1 %v1353_v13 }
 0x5dd   :  { %1082 = vmatprep.subr.bf16.mxu1 %v1242_v0 }
 0x5e0   :  { %1083 = vmatpush3.bf16.msra.mxu1 %v1362_v14 }
 0x5e1   :  { %1084 = vmatprep.subr.bf16.mxu1 %v1242_v0 }
 0x5e4   :  { %1085 = vmatpush3.bf16.msra.mxu1 %v1371_v15 }
 0x5e5   :  { %1110 = vmatprep.subr.mxu1 %v1242_v0 }
 0x687   :  { %v500_v20 = vpop.f32.mrf.mxu1 }
 0x688   :  { %v501_v22 = vadd.f32 %v1412_v19, %v500_v20 }
 0x689   :  { %v1048_v23 = vpop.f32.mrf.mxu1 }
 0x68a   :  { %v506_v24 = vadd.f32 %v501_v22, %v133_v21 }
 0x68b   :  { %v503_v25 = vpop.f32.mrf.mxu1 }
 0x68c   :  { %v507_v26 = vmul.f32 0.5, %v506_v24  ;;  %v714_v25 = vld [vmem:[#allocation3 + $0x78] sm:$0xff] }
 0x68d   :  { %v1049_v27 = vpop.f32.mrf.mxu1 }
 0x68e   :  { %1179 = vtanh.f32 %v507_v26  ;;  %v713_v26 = vld [vmem:[#allocation3 + $0x70] sm:$0xff]  ;;  %v712_v27 = vld [vmem:[#allocation3 + $0x68] sm:$0xff] }
 0x69b   :  { %v1180_v28 = vpop.eup %1179 }
 0x69c   :  { %v509_v29 = vadd.f32 1.0, %v1180_v28  ;;  %v711_v28 = vld [vmem:[#allocation3 + $0x60] sm:$0xff] }
 0x69e   :  { %v510_v30 = vmul.f32 0.5, %v509_v29 }
 0x6a0   :  { %513 = vrot.lane.b32.xlu1 %v510_v30, %s1246_s18  ;;  %511 = vrot.lane.b32.xlu0 %v510_v30, %s1245_s17 }
 0x712   :  { %v512_v31 = vpop.permute.xlu0 %511  ;;  %v514_v36 = vpop.permute.xlu1 %513 }
 0x713   :  { %v515_v32 = vmul.f32 %v512_v31, %v501_v22 }
 0x715   :  { %v516_v33 = vadd.f32 %v515_v32, %v133_v21 }
 0x717   :  { %1181 = vtanh.f32 %v516_v33 }
 0x724   :  { %v1182_v53 = vpop.eup %1181 }
 0x725   :  { %v518_v35 = vsub.f32 %v462_v34, %v1182_v53 }
 0x727   :  { %v519_v37 = vmul.f32 %v518_v35, %v514_v36  ;;  %v710_v35 = vld [vmem:[#allocation3 + $0x58] sm:$0xff]  ;;  %v709_v36 = vld [vmem:[#allocation3 + $0x50] sm:$0xff] }
 0x729   :  { %v520_v38 = vadd.f32 %v1182_v53, %v519_v37  ;;  %v708_v37 = vld [vmem:[#allocation3 + $0x48] sm:$0xff] }
 0x72b   :  { %v836_v17 = vpack.c.bf16 %v520_v38, %v520_v38  ;;  %v521_v46 = vsel %vm158_vm2, %v520_v38, 0.0  ;;  %v707_v38 = vld [vmem:[#allocation3 + $0x40] sm:$0xff] }
 0x72d   :  { %1067 = vmatmul.mubr.msk.bf16.vlgmr.msra.gmra.mxu0 %vm1440_vm3, %v836_v17 }
 0x72e   :  { %1091 = vmatpush3.bf16.msra.mxu0 %v1297_v1  ;;  %1106 = vmatprep.mubr.msk.bf16.mxu0 %vm1243_vm0, %v1242_v0 }
 0x72f   :  { %1092 = vmatprep.subr.bf16.mxu0 %v1242_v0 }
 0x732   :  { %1093 = vmatpush3.bf16.msra.mxu0 %v1303_v2  ;;  %v136_v2 = vadd.f32 %v1407_v18, %v1472_v55  ;;  %v706_v18 = vld [vmem:[#allocation3 + $0x38] sm:$0xff] }
 0x733   :  { %1094 = vmatprep.subr.bf16.mxu0 %v1242_v0 }
 0x736   :  { %1095 = vmatpush3.bf16.msra.mxu0 %v1313_v4 }
 0x737   :  { %1096 = vmatprep.subr.bf16.mxu0 %v1242_v0 }
 0x73a   :  { %1097 = vmatpush3.bf16.msra.mxu0 %v1333_v11 }
 0x73b   :  { %1098 = vmatprep.subr.bf16.mxu0 %v1242_v0 }
 0x73e   :  { %1099 = vmatpush3.bf16.msra.mxu0 %v1344_v12 }
 0x73f   :  { %1100 = vmatprep.subr.bf16.mxu0 %v1242_v0 }
 0x742   :  { %1101 = vmatpush3.bf16.msra.mxu0 %v1353_v13 }
 0x743   :  { %1102 = vmatprep.subr.bf16.mxu0 %v1242_v0 }
 0x746   :  { %1103 = vmatpush3.bf16.msra.mxu0 %v1362_v14 }
 0x747   :  { %1104 = vmatprep.subr.bf16.mxu0 %v1242_v0 }
 0x74a   :  { %1105 = vmatpush3.bf16.msra.mxu0 %v1371_v15 }
 0x7ed   :  { %v559_v1 = vpop.f32.mrf.mxu0 }
 0x7ee   :  { %v560_v4 = vadd.f32 %v1412_v19, %v559_v1 }
 0x7ef   :  { %v1068_v11 = vpop.f32.mrf.mxu0 }
 0x7f0   :  { %v565_v12 = vadd.f32 %v560_v4, %v136_v2  ;;  %v702_v11 = vld [vmem:[#allocation3 + $0x18] sm:$0xff] }
 0x7f1   :  { %v562_v39 = vpop.f32.mrf.mxu0 }
 0x7f2   :  { %v566_v40 = vmul.f32 0.5, %v565_v12  ;;  %v701_v12 = vld [vmem:[#allocation3 + $0x10] sm:$0xff]  ;;  %v700_v39 = vld [vmem:[#allocation3 + $0x8] sm:$0xff] }
 0x7f3   :  { %v1069_v41 = vpop.f32.mrf.mxu0 }
 0x7f4   :  { %1183 = vtanh.f32 %v566_v40  ;;  %v699_v40 = vld [vmem:[#allocation3] sm:$0xff] }
 0x801   :  { %v1184_v13 = vpop.eup %1183 }
 0x802   :  { %v568_v43 = vadd.f32 1.0, %v1184_v13 }
 0x804   :  { %v569_v44 = vmul.f32 0.5, %v568_v43 }
 0x806   :  { %572 = vrot.lane.b32.xlu1 %v569_v44, %s1246_s18  ;;  %570 = vrot.lane.b32.xlu0 %v569_v44, %s1245_s17 }
 0x878   :  { %v571_v14 = vpop.permute.xlu0 %570  ;;  %v573_v49 = vpop.permute.xlu1 %572 }
 0x879   :  { %v574_v15 = vmul.f32 %v571_v14, %v560_v4  ;;  %v703_v4 = vld [vmem:[#allocation3 + $0x20] sm:$0xff] }
 0x87b   :  { %v575_v45 = vadd.f32 %v574_v15, %v136_v2  ;;  %v704_v2 = vld [vmem:[#allocation3 + $0x28] sm:$0xff] }
 0x87d   :  { %1185 = vtanh.f32 %v575_v45 }
 0x88a   :  { %v1186_v55 = vpop.eup %1185 }
 0x88b   :  { %v577_v47 = vsub.f32 %v521_v46, %v1186_v55 }
 0x88d   :  { %v578_v51 = vmul.f32 %v577_v47, %v573_v49 }
 0x88f   :  { %v579_v56 = vadd.f32 %v1186_v55, %v578_v51 }
 0x891   :  { %v839_v57 = vpack.c.bf16 %v579_v56, %v579_v56  ;;  %v580_v16 = vsel %vm158_vm2, %v579_v56, 0.0 }
 0x893   :  { %1087 = vmatmul.mubr.msk.bf16.vlgmr.msra.gmra.mxu1 %vm1440_vm3, %v839_v57 }
 0x894   :  { %1142 = vmatprep.mubr.msk.f32.mxu1 %vm1243_vm0, %v1242_v0  ;;  %1111 = vmatpush3.msra.mxu1 %v714_v25 }
 0x895   :  { %1112 = vmatprep.subr.mxu1 %v1242_v0 }
 0x896   :  { %1113 = vmatpush3.msra.mxu1 %v713_v26 }
 0x897   :  { %1114 = vmatprep.subr.mxu1 %v1242_v0 }
 0x898   :  { %1115 = vmatpush3.msra.mxu1 %v712_v27 }
 0x899   :  { %1116 = vmatprep.subr.mxu1 %v1242_v0 }
 0x89a   :  { %1117 = vmatpush3.msra.mxu1 %v711_v28 }
 0x89b   :  { %1118 = vmatprep.subr.mxu1 %v1242_v0 }
 0x89c   :  { %1119 = vmatpush3.msra.mxu1 %v710_v35 }
 0x89d   :  { %1120 = vmatprep.subr.mxu1 %v1242_v0 }
 0x89e   :  { %1121 = vmatpush3.msra.mxu1 %v709_v36 }
 0x89f   :  { %1122 = vmatprep.subr.mxu1 %v1242_v0 }
 0x8a0   :  { %1123 = vmatpush3.msra.mxu1 %v708_v37 }
 0x8a1   :  { %1124 = vmatprep.subr.mxu1 %v1242_v0 }
 0x8a2   :  { %1125 = vmatpush3.msra.mxu1 %v707_v38 }
 0x8a3   :  { %1126 = vmatprep.subr.mxu1 %v1242_v0 }
 0x8a4   :  { %1127 = vmatpush3.msra.mxu1 %v706_v18 }
 0x8a5   :  { %1128 = vmatprep.subr.mxu1 %v1242_v0 }
 0x8a6   :  { %1129 = vmatpush3.msra.mxu1 %v705_v54 }
 0x8a7   :  { %1130 = vmatprep.subr.mxu1 %v1242_v0 }
 0x8a8   :  { %1131 = vmatpush3.msra.mxu1 %v704_v2 }
 0x8a9   :  { %1132 = vmatprep.subr.mxu1 %v1242_v0 }
 0x8aa   :  { %1133 = vmatpush3.msra.mxu1 %v703_v4 }
 0x8ab   :  { %1134 = vmatprep.subr.mxu1 %v1242_v0 }
 0x8ac   :  { %1135 = vmatpush3.msra.mxu1 %v702_v11 }
 0x8ad   :  { %1136 = vmatprep.subr.mxu1 %v1242_v0 }
 0x8ae   :  { %1137 = vmatpush3.msra.mxu1 %v701_v12 }
 0x8af   :  { %1138 = vmatprep.subr.mxu1 %v1242_v0 }
 0x8b0   :  { %1139 = vmatpush3.msra.mxu1 %v700_v39 }
 0x8b1   :  { %1140 = vmatprep.subr.mxu1 %v1242_v0  ;;  %v844_v0 = vld [vmem:[%s1641_s6] ss:$0 sm:$0xff] }
 0x8b2   :  { %1141 = vmatpush3.msra.mxu1 %v699_v40 }
 0x953   :  { %v618_v58 = vpop.f32.mrf.mxu1 }
 0x954   :  { %v619_v60 = vadd.f32 %v1412_v19, %v618_v58 }
 0x955   :  { %v1088_v61 = vpop.f32.mrf.mxu1 }
 0x956   :  { %v624_v62 = vadd.f32 %v619_v60, %v141_v59 }
 0x957   :  { %v621_v63 = vpop.f32.mrf.mxu1 }
 0x958   :  { %v625_v3 = vmul.f32 0.5, %v624_v62 }
 0x959   :  { %v1089_v5 = vpop.f32.mrf.mxu1 }
 0x95a   :  { %1187 = vtanh.f32 %v625_v3 }
 0x967   :  { %v1188_v50 = vpop.eup %1187 }
 0x968   :  { %v627_v6 = vadd.f32 1.0, %v1188_v50 }
 0x96a   :  { %v628_v7 = vmul.f32 0.5, %v627_v6 }
 0x96c   :  { %631 = vrot.lane.b32.xlu1 %v628_v7, %s1246_s18  ;;  %629 = vrot.lane.b32.xlu0 %v628_v7, %s1245_s17 }
 0x9de   :  { %v630_v8 = vpop.permute.xlu0 %629  ;;  %v632_v21 = vpop.permute.xlu1 %631 }
 0x9df   :  { %v633_v9 = vmul.f32 %v630_v8, %v619_v60 }
 0x9e1   :  { %v634_v10 = vadd.f32 %v633_v9, %v141_v59 }
 0x9e3   :  { %1189 = vtanh.f32 %v634_v10 }
 0x9f0   :  { %v1190_v52 = vpop.eup %1189 }
 0x9f1   :  { %v636_v20 = vsub.f32 %v580_v16, %v1190_v52 }
 0x9f3   :  { %v637_v22 = vmul.f32 %v636_v20, %v632_v21 }
 0x9f5   :  { %v1598_v23 = vadd.f32 %v1190_v52, %v637_v22 }
 0x9f7   :  { %v842_v24 = vpack.c.bf16 %v1598_v23, %v1598_v23  ;;  %v639_v14 = vsel %vm158_vm2, %v1598_v23, 0.0 }
 0x9f9   :  { %1107 = vmatmul.mubr.msk.bf16.vlgmr.msra.gmra.mxu0 %vm1440_vm3, %v842_v24 }
 0xab9   :  { %v677_v29 = vpop.f32.mrf.mxu0 }
 0xaba   :  { %v678_v30 = vadd.f32 %v1412_v19, %v677_v29 }
 0xabb   :  { %v1108_v31 = vpop.f32.mrf.mxu0 }
 0xabc   :  { %v683_v32 = vadd.f32 %v678_v30, %v144_v48 }
 0xabd   :  { %v680_v33 = vpop.f32.mrf.mxu0 }
 0xabe   :  { %v684_v53 = vmul.f32 0.5, %v683_v32 }
 0xabf   :  { %v1109_v34 = vpop.f32.mrf.mxu0 }
 0xac0   :  { %1191 = vtanh.f32 %v684_v53 }
 0xacd   :  { %v1192_v19 = vpop.eup %1191 }
 0xace   :  { %v686_v17 = vadd.f32 1.0, %v1192_v19 }
 0xad0   :  { %v687_v1 = vmul.f32 0.5, %v686_v17 }
 0xad2   :  { %690 = vrot.lane.b32.xlu1 %v687_v1, %s1246_s18  ;;  %688 = vrot.lane.b32.xlu0 %v687_v1, %s1245_s17 }
 0xb44   :  { %v689_v41 = vpop.permute.xlu0 %688  ;;  %v691_v45 = vpop.permute.xlu1 %690 }
 0xb45   :  { %v692_v13 = vmul.f32 %v689_v41, %v678_v30 }
 0xb47   :  { %v693_v43 = vadd.f32 %v692_v13, %v144_v48 }
 0xb49   :  { %1193 = vtanh.f32 %v693_v43 }
 0xb56   :  { %v1194_v44 = vpop.eup %1193 }
 0xb57   :  { %v695_v15 = vsub.f32 %v639_v14, %v1194_v44 }
 0xb59   :  { %v696_v55 = vmul.f32 %v695_v15, %v691_v45 }
 0xb5b   :  { %v697_v46 = vadd.f32 %v1194_v44, %v696_v55 }
 0xb5d   :  { %1143 = vmatmul.mubr.msk.f32.vlgmr.msra.gmra.mxu1 %vm158_vm2, %v697_v46 }
 0xc1d   :  { %v788_v47 = vpop.f32.mrf.mxu1 }
 0xc1e   :  { %v789_v49 = vadd.f32 %v844_v0, %v788_v47 }
 0xc1f   :  { %v1144_v51 = vpop.f32.mrf.mxu1 }
 0xc20   :  { %792 = vst [vmem:[#allocation6] sm:$0xff] %v789_v49 }
 0xc21   :  { %1226 = shalt.err (!%p1223_p9)
}
 0xc22   :  { %802 = dma.vmem_to_hbm [thread:$0]  %s800_s20, 128, %s1642_s7, [#allocation5]  }
 0xc23   :  { %1237 = dma.done.wait [#allocation5], 128  }
 0xc24   :  { %1238 = vsyncadd [#allocation5], 4294967168 }
 0xc25   :  { %806 = vsyncpa [#allocation4], 1 }
 0xc26   :  { %807 = vsyncpa [#allocation5], 1 }

</bundles_post_ra>
